<compile_context>
chip_gen: v7x
topology: tpu7x:2x2x1
jax: 0.10.0
libtpu: 0.0.40
codegen_flags: <defaults>
</compile_context>

<pallas_src>
import jax
import jax.numpy as jnp
from jax import lax
from jax.experimental import pallas as pl
from jax.experimental.pallas import tpu as pltpu

STATE_SPACE = 6      # env.high_level_state().shape[0] (small synthetic choice)
HIDDEN = 128
N_ACTIONS = 2
DROP_P = 0.6
DROPOUT_SCALE = 1.0 / (1.0 - DROP_P)
# drop an element iff its uniform uint32 < DROP_P * 2**32
KEEP_THRESH_U32 = int(round(DROP_P * (2 ** 32)))
MAX_TILE_B = 256     # batch rows per grid step (multiple of 8)


def policy_kernel(x_ref, bits_ref, w1_ref, b1_ref, wdiff_ref, bdiff_ref, out_ref):
    # fc1: (TB, S) @ (S, 128) + (1, 128)  -- single MXU push
    z = jnp.dot(x_ref[...], w1_ref[...], preferred_element_type=jnp.float32) + b1_ref[...]

    # Dropout(p=0.6) + ReLU, fused: the mask is {0,1}, so relu(mask*z) == where(keep, relu(z), 0).
    # Keep-test directly on the raw uint32 bits; the 1/(1-p) scale is folded into wdiff.
    keep = bits_ref[...] >= jnp.uint32(KEEP_THRESH_U32)
    h = jnp.where(keep, jnp.maximum(z, 0.0), 0.0)

    # fc2 + softmax over 2 actions, VPU/EUP only:
    #   d = logit1 - logit0  (elementwise mul + cross-lane sum; no second MXU matmul)
    #   softmax([l0, l1]) == [sigmoid(-d), sigmoid(+d)]
    d = jnp.sum(h * wdiff_ref[...], axis=-1, keepdims=True) + bdiff_ref[...]   # (TB, 1)
    sign = jnp.where(
        lax.broadcasted_iota(jnp.int32, (1, N_ACTIONS), 1) == 0, -1.0, 1.0)    # [-1, +1]
    # NOTE: last dim of 2 -> masked store; for very large B a lane-dense (2, B) layout
    # (transposed in the wrapper) would be faster, but it is irrelevant at these sizes.
    out_ref[...] = 1.0 / (1.0 + jnp.exp(-(d * sign)))


def policy_net_forward(x, params, key):
    """x: (B, STATE_SPACE) f32, key: jax PRNG key -> probs: (B, N_ACTIONS) f32."""
    w1, b1, w2, b2 = params
    B = x.shape[0]

    # Training-mode dropout randomness: fresh bits per call (caller supplies a fresh key).
    bits = jax.random.bits(key, (B, HIDDEN), dtype=jnp.uint32)

    # Fold the dropout 1/(1-p) scale into fc2 and collapse fc2 to its difference column.
    # (Tiny 128x2 ops; in a training loop these can be hoisted to parameter-init time.)
    w2s = w2 * DROPOUT_SCALE
    w_diff = (w2s[:, 1] - w2s[:, 0]).reshape(1, HIDDEN)
    b_diff = (b2[:, 1] - b2[:, 0]).reshape(1, 1)

    tile_b = B if B <= MAX_TILE_B else MAX_TILE_B
    grid = (pl.cdiv(B, tile_b),)

    return pl.pallas_call(
        policy_kernel,
        out_shape=jax.ShapeDtypeStruct((B, N_ACTIONS), jnp.float32),
        grid=grid,
        in_specs=[
            pl.BlockSpec((tile_b, STATE_SPACE), lambda i: (i, 0)),   # x (tiled over batch)
            pl.BlockSpec((tile_b, HIDDEN), lambda i: (i, 0)),        # dropout bits
            pl.BlockSpec((STATE_SPACE, HIDDEN), lambda i: (0, 0)),   # w1 (VMEM-resident)
            pl.BlockSpec((1, HIDDEN), lambda i: (0, 0)),             # b1
            pl.BlockSpec((1, HIDDEN), lambda i: (0, 0)),             # w_diff
            pl.BlockSpec((1, 1), lambda i: (0, 0)),                  # b_diff
        ],
        out_specs=pl.BlockSpec((tile_b, N_ACTIONS), lambda i: (i, 0)),
        compiler_params=pltpu.CompilerParams(
            dimension_semantics=("parallel",)),   # shard batch tiles across TCs (v7x)
    )(x, bits, w1, b1, w_diff, b_diff)
    # TODO(synk): optionally fuse action sampling + log-prob emission to avoid the
    # per-environment-step host round-trip (outside the module's forward() semantics).


def reference_forward(x, params, key):
    """Pure-JAX reference with the same dropout bits (PyTorch op order)."""
    w1, b1, w2, b2 = params
    B = x.shape[0]
    bits = jax.random.bits(key, (B, HIDDEN), dtype=jnp.uint32)
    keep = bits >= jnp.uint32(KEEP_THRESH_U32)
    z = x @ w1 + b1
    h = jnp.where(keep, z, 0.0) * DROPOUT_SCALE     # Dropout (training mode)
    h = jnp.maximum(h, 0.0)                          # ReLU
    logits = h @ w2 + b2                             # fc2
    return jax.nn.softmax(logits, axis=-1)


def init_params(key):
    """nn.Linear default init U(-1/sqrt(fan_in), 1/sqrt(fan_in)); weights stored [in, out]."""
    k1, k2, k3, k4 = jax.random.split(key, 4)
    bound1 = 1.0 / jnp.sqrt(STATE_SPACE)
    bound2 = 1.0 / jnp.sqrt(HIDDEN)
    w1 = jax.random.uniform(k1, (STATE_SPACE, HIDDEN), jnp.float32, -bound1, bound1)
    b1 = jax.random.uniform(k2, (1, HIDDEN), jnp.float32, -bound1, bound1)
    w2 = jax.random.uniform(k3, (HIDDEN, N_ACTIONS), jnp.float32, -bound2, bound2)
    b2 = jax.random.uniform(k4, (1, N_ACTIONS), jnp.float32, -bound2, bound2)
    return w1, b1, w2, b2


if __name__ == "__main__":
    key = jax.random.PRNGKey(0)
    k_params, k_x, k_drop, k_x2, k_drop2 = jax.random.split(key, 5)
    params = init_params(k_params)

    # Small batch (single grid step).
    B = 8
    x = jax.random.normal(k_x, (B, STATE_SPACE), jnp.float32)
    probs = jax.block_until_ready(policy_net_forward(x, params, k_drop))
    assert probs.shape == (B, N_ACTIONS)
    assert bool(jnp.all(jnp.isfinite(probs)))
    assert bool(jnp.all(jnp.abs(jnp.sum(probs, axis=-1) - 1.0) < 1e-5))
    ref = reference_forward(x, params, k_drop)
    assert bool(jnp.all(jnp.abs(probs - ref) < 1e-4))

    # Larger rollout batch (multi-tile "parallel" grid over batch).
    B2 = 512
    x2 = jax.random.normal(k_x2, (B2, STATE_SPACE), jnp.float32)
    probs2 = jax.block_until_ready(policy_net_forward(x2, params, k_drop2))
    assert probs2.shape == (B2, N_ACTIONS)
    assert bool(jnp.all(jnp.isfinite(probs2)))
    assert bool(jnp.all(jnp.abs(jnp.sum(probs2, axis=-1) - 1.0) < 1e-5))
    ref2 = reference_forward(x2, params, k_drop2)
    assert bool(jnp.all(jnp.abs(probs2 - ref2) < 1e-4))

    print("KERNEL_OK")
</pallas_src>

<mosaic_0001>
module attributes {stable_mosaic.version = 11 : i64} {
  func.func @policy_kernel(%arg0: i32, %arg1: memref<8x6xf32, #tpu.memory_space<vmem>>, %arg2: memref<8x128xi32, #tpu.memory_space<vmem>>, %arg3: memref<6x128xf32, #tpu.memory_space<vmem>>, %arg4: memref<1x128xf32, #tpu.memory_space<vmem>>, %arg5: memref<1x128xf32, #tpu.memory_space<vmem>>, %arg6: memref<1x1xf32, #tpu.memory_space<vmem>>, %arg7: memref<8x2xf32, #tpu.memory_space<vmem>>) attributes {dimension_semantics = [#tpu.dimension_semantics<parallel>], iteration_bounds = array<i64: 1>, scalar_prefetch = 0 : i64, scratch_operands = 0 : i64, tpu.core_type = #tpu.core_type<tc>, window_params = [{transform_indices = @transform_0, window_bounds = array<i64: 8, 6>}, {transform_indices = @transform_1, window_bounds = array<i64: 8, 128>}, {pipeline_mode = #tpu.pipeline_mode<synchronous>, transform_indices = @transform_2, window_bounds = array<i64: 6, 128>}, {pipeline_mode = #tpu.pipeline_mode<synchronous>, transform_indices = @transform_3, window_bounds = array<i64: 1, 128>}, {pipeline_mode = #tpu.pipeline_mode<synchronous>, transform_indices = @transform_4, window_bounds = array<i64: 1, 128>}, {pipeline_mode = #tpu.pipeline_mode<synchronous>, transform_indices = @transform_5, window_bounds = array<i64: 1, 1>}, {transform_indices = @transform_6, window_bounds = array<i64: 8, 2>}]} {
    %c0 = arith.constant 0 : index
    %c0_0 = arith.constant 0 : index
    %0 = vector.load %arg1[%c0, %c0_0] : memref<8x6xf32, #tpu.memory_space<vmem>>, vector<8x6xf32>
    %c0_1 = arith.constant 0 : index
    %c0_2 = arith.constant 0 : index
    %1 = vector.load %arg3[%c0_1, %c0_2] : memref<6x128xf32, #tpu.memory_space<vmem>>, vector<6x128xf32>
    %cst = arith.constant dense<0.000000e+00> : vector<8x128xf32>
    %2 = tpu.matmul %0, %1, %cst {dimension_numbers = #tpu.dot_dimension_numbers<[1], [0], [0], [1], [0, 0, 1, 1], [], []>} : vector<8x6xf32>, vector<6x128xf32>, vector<8x128xf32> -> vector<8x128xf32>
    %c0_3 = arith.constant 0 : index
    %c0_4 = arith.constant 0 : index
    %3 = vector.load %arg4[%c0_3, %c0_4] : memref<1x128xf32, #tpu.memory_space<vmem>>, vector<1x128xf32>
    %4 = vector.broadcast %3 : vector<1x128xf32> to vector<8x128xf32>
    %5 = arith.addf %2, %4 : vector<8x128xf32>
    %c0_5 = arith.constant 0 : index
    %c0_6 = arith.constant 0 : index
    %6 = vector.load %arg2[%c0_5, %c0_6] : memref<8x128xi32, #tpu.memory_space<vmem>>, vector<8x128xi32>
    %c-1717986918_i32 = arith.constant -1717986918 : i32
    %7 = vector.broadcast %c-1717986918_i32 : i32 to vector<8x128xi32>
    %8 = arith.cmpi uge, %6, %7 : vector<8x128xi32>
    %cst_7 = arith.constant 0.000000e+00 : f32
    %9 = vector.broadcast %cst_7 : f32 to vector<8x128xf32>
    %10 = arith.maximumf %5, %9 : vector<8x128xf32>
    %cst_8 = arith.constant 0.000000e+00 : f32
    %11 = vector.broadcast %cst_8 : f32 to vector<8x128xf32>
    %12 = arith.select %8, %10, %11 : vector<8x128xi1>, vector<8x128xf32>
    %c0_9 = arith.constant 0 : index
    %c0_10 = arith.constant 0 : index
    %13 = vector.load %arg5[%c0_9, %c0_10] : memref<1x128xf32, #tpu.memory_space<vmem>>, vector<1x128xf32>
    %14 = vector.broadcast %13 : vector<1x128xf32> to vector<8x128xf32>
    %15 = arith.mulf %12, %14 : vector<8x128xf32>
    %cst_11 = arith.constant dense<0.000000e+00> : vector<8xf32>
    %16 = vector.multi_reduction <add>, %15, %cst_11 [1] : vector<8x128xf32> to vector<8xf32>
    %17 = vector.shape_cast %16 : vector<8xf32> to vector<8x1xf32>
    %c0_12 = arith.constant 0 : index
    %c0_13 = arith.constant 0 : index
    %18 = vector.load %arg6[%c0_12, %c0_13] : memref<1x1xf32, #tpu.memory_space<vmem>>, vector<1x1xf32>
    %19 = vector.broadcast %18 : vector<1x1xf32> to vector<8x1xf32>
    %20 = arith.addf %17, %19 : vector<8x1xf32>
    %21 = tpu.iota {dimensions = array<i32: 1>} : vector<1x2xi32>
    %c0_i32 = arith.constant 0 : i32
    %22 = vector.broadcast %c0_i32 : i32 to vector<1x2xi32>
    %23 = arith.cmpi eq, %21, %22 : vector<1x2xi32>
    %cst_14 = arith.constant -1.000000e+00 : f32
    %cst_15 = arith.constant 1.000000e+00 : f32
    %24 = vector.broadcast %cst_14 : f32 to vector<1x2xf32>
    %25 = vector.broadcast %cst_15 : f32 to vector<1x2xf32>
    %26 = arith.select %23, %24, %25 : vector<1x2xi1>, vector<1x2xf32>
    %27 = vector.broadcast %20 : vector<8x1xf32> to vector<8x2xf32>
    %28 = vector.broadcast %26 : vector<1x2xf32> to vector<8x2xf32>
    %29 = arith.mulf %27, %28 : vector<8x2xf32>
    %cst_16 = arith.constant 0.000000e+00 : f32
    %30 = vector.broadcast %cst_16 : f32 to vector<8x2xf32>
    %31 = arith.subf %30, %29 : vector<8x2xf32>
    %32 = math.exp %31 : vector<8x2xf32>
    %cst_17 = arith.constant 1.000000e+00 : f32
    %33 = vector.broadcast %cst_17 : f32 to vector<8x2xf32>
    %34 = arith.addf %33, %32 : vector<8x2xf32>
    %cst_18 = arith.constant 1.000000e+00 : f32
    %35 = vector.broadcast %cst_18 : f32 to vector<8x2xf32>
    %36 = arith.divf %35, %34 : vector<8x2xf32>
    %c0_19 = arith.constant 0 : index
    %c0_20 = arith.constant 0 : index
    %37 = vector.load %arg7[%c0_19, %c0_20] : memref<8x2xf32, #tpu.memory_space<vmem>>, vector<8x2xf32>
    tpu.vector_store %arg7[%c0_19, %c0_20], %36 {strides = array<i32>} : memref<8x2xf32, #tpu.memory_space<vmem>>, vector<8x2xf32>,
    return
  }
  func.func @transform_0(%arg0: i32) -> (i32, i32) {
    %c0_i32 = arith.constant 0 : i32
    %c0_i32_0 = arith.constant 0 : i32
    return %arg0, %c0_i32 : i32, i32
  }
  func.func @transform_1(%arg0: i32) -> (i32, i32) {
    %c0_i32 = arith.constant 0 : i32
    %c0_i32_0 = arith.constant 0 : i32
    return %arg0, %c0_i32 : i32, i32
  }
  func.func @transform_2(%arg0: i32) -> (i32, i32) {
    %c0_i32 = arith.constant 0 : i32
    %c0_i32_0 = arith.constant 0 : i32
    %c0_i32_1 = arith.constant 0 : i32
    return %c0_i32, %c0_i32_0 : i32, i32
  }
  func.func @transform_3(%arg0: i32) -> (i32, i32) {
    %c0_i32 = arith.constant 0 : i32
    %c0_i32_0 = arith.constant 0 : i32
    %c0_i32_1 = arith.constant 0 : i32
    return %c0_i32, %c0_i32_0 : i32, i32
  }
  func.func @transform_4(%arg0: i32) -> (i32, i32) {
    %c0_i32 = arith.constant 0 : i32
    %c0_i32_0 = arith.constant 0 : i32
    %c0_i32_1 = arith.constant 0 : i32
    return %c0_i32, %c0_i32_0 : i32, i32
  }
  func.func @transform_5(%arg0: i32) -> (i32, i32) {
    %c0_i32 = arith.constant 0 : i32
    %c0_i32_0 = arith.constant 0 : i32
    %c0_i32_1 = arith.constant 0 : i32
    return %c0_i32, %c0_i32_0 : i32, i32
  }
  func.func @transform_6(%arg0: i32) -> (i32, i32) {
    %c0_i32 = arith.constant 0 : i32
    %c0_i32_0 = arith.constant 0 : i32
    return %arg0, %c0_i32 : i32, i32
  }
}

</mosaic_0001>

<bundles_post_ra>
// kernel: tpu_custom_call.1
= control target key start
LH: loop header
LB: loop body
LE: loop exit
PB: predicated region body
PF: predicated region fallthrough
CT: control target
= control target key end

     0   :  { %s333_s0 = inlined_call_operand.hbm [shape: f32[8,6], index: 0, kind: input, shape index: {}]   ;;  %s334_s1 = inlined_call_operand.hbm [shape: u32[8,128], index: 1, kind: input, shape index: {}]   ;;  %s335_s2 = inlined_call_operand.vmem [shape: f32[6,128], index: 2, kind: input, shape index: {}]   ;;  %s336_s3 = inlined_call_operand.vmem [shape: f32[1,128], index: 3, kind: input, shape index: {}]   ;;  %s337_s4 = inlined_call_operand.vmem [shape: f32[1,128], index: 4, kind: input, shape index: {}]   ;;  %s338_s5 = inlined_call_operand.<no memory space> [shape: f32[1,1], index: 5, kind: input, shape index: {}]   ;;  %s339_s6 = inlined_call_operand.vmem [shape: f32[8,2], index: 6, kind: output, shape index: {}]  }
   0x1   :  { %v11_v0 = vstv %s338_s5 }
   0x2   :  { %12 = vst [vmem:[#allocation2] sm:$0x1] %v11_v0 }
   0x3   :  { %13 = vsyncpa [#allocation4], 0 }
   0x4   :  { %14 = vsyncpa [#allocation6], 0  ;;  %s253_s23 = smov [#allocation3]   ;;  %s254_s25 = smov [#allocation5]  }
   0x5   :  { %s21_s24 = sshll.u32 %s253_s23, 4  ;;  %s31_s26 = sshll.u32 %s254_s25, 4  ;;  %s22_s24 = int_to_ptr.vmem [resolvable:$true] %s21_s24  ;;  %s32_s26 = int_to_ptr.vmem [resolvable:$true] %s31_s26 }
   0x6   :  { %s205_s29 = scalar_lea.hbm %s333_s0, 128 }
   0x7   :  { %p206_p0 = scmp.ne.s32.totalorder %s333_s0, %s205_s29  ;;  %p209_p1 = scmp.lt.u32.totalorder %s205_s29, %s333_s0 }
   0x9   :  { %p211_p2 = pnand %p209_p1, %p206_p0 }
   0xb   :  { %214 = shalt.err (!%p211_p2)
}
   0xc   :  { %s215_s5 = scalar_lea.vmem %s22_s24, 128  ;;  %p220_p4 = scmp.lt.s32.totalorder %s22_s24, %s22_s24 }
   0xd   :  { %p216_p3 = scmp.ne.s32.totalorder %s22_s24, %s215_s5  ;;  %p221_p5 = scmp.lt.s32.totalorder %s215_s5, %s215_s5 }
   0xf   :  { %p222_p6 = por %p221_p5, %p220_p4 }
  0x11   :  { %p223_p7 = pnand %p222_p6, %p216_p3 }
  0x13   :  { %226 = shalt.err (!%p223_p7)
}
  0x14   :  { %24 = dma.hbm_to_vmem [thread:$0]  %s333_s0, 128, %s22_s24, [#allocation4]  }
  0x15   :  { %s227_s14 = scalar_lea.hbm %s334_s1, 128 }
  0x16   :  { %p228_p8 = scmp.ne.s32.totalorder %s334_s1, %s227_s14  ;;  %p231_p9 = scmp.lt.u32.totalorder %s227_s14, %s334_s1 }
  0x18   :  { %p233_p10 = pnand %p231_p9, %p228_p8 }
  0x1a   :  { %236 = shalt.err (!%p233_p10)
}
  0x1b   :  { %s237_s19 = scalar_lea.vmem %s32_s26, 128  ;;  %p242_p12 = scmp.lt.s32.totalorder %s32_s26, %s32_s26 }
  0x1c   :  { %p238_p11 = scmp.ne.s32.totalorder %s32_s26, %s237_s19  ;;  %p243_p13 = scmp.lt.s32.totalorder %s237_s19, %s237_s19 }
  0x1e   :  { %p244_p0 = por %p243_p13, %p242_p12 }
  0x20   :  { %p245_p1 = pnand %p244_p0, %p238_p11 }
  0x22   :  { %248 = shalt.err (!%p245_p1)
}
  0x23   :  { %34 = dma.hbm_to_vmem [thread:$0]  %s334_s1, 128, %s32_s26, [#allocation6]  }
  0x24   :  { %249 = dma.done.wait [#allocation4], 128  }
  0x25   :  { %250 = vsyncadd [#allocation4], 4294967168 }
  0x26   :  { %251 = dma.done.wait [#allocation6], 128  }
  0x27   :  { %252 = vsyncadd [#allocation6], 4294967168  ;;  %v255_v1 = vmov 0.0   ;;  %vm256_vm0 = vmmov 0   ;;  %vm62_vm1 = vcmask 1045504   ;;  %vm58_vm2 = vcmask 48128  }
  0x28   :  { %189 = vmatprep.subr.mxu0 %v255_v1  ;;  %191 = vmatprep.mubr.msk.f32.mxu0 %vm256_vm0, %v255_v1  ;;  %v50_v2 = vld [vmem:[%s335_s2] sm:$0x3f]  ;;  %v136_v5 = vld [vmem:[#allocation5] sm:$0xff]  ;;  %v257_v13 = vmov 0   ;;  %v158_v17 = vlaneseq  ;;  %v258_v19 = vmov 1.0   ;;  %vm174_vm5 = vcmask 15360  }
  0x29   :  { %v49_v3 = vld [vmem:[#allocation3] sm:$0xff]  ;;  %190 = vmatpush3.msk.msra.mxu0 %vm62_vm1, %v50_v2  ;;  %v182_v4 = vld [vmem:[%s336_s3] ss:$0 sm:$0xff]  ;;  %vm137_vm3 = vcmp.ge.u32.totalorder %v136_v5, 2576980378  ;;  %200 = vset.pattern.permute.xlu0 %v257_v13 }
  0x2a   :  { %192 = vmatmul.mubr.msk.f32.vlgmr.msra.gmra.mrb[0].mxu0 %vm58_vm2, %v49_v3  ;;  %v185_v10 = vld [vmem:[%s337_s4] ss:$0 sm:$0xff]  ;;  %v159_v18 = vand.u32 127, %v158_v17 }
  0x2b   :  { %v186_v14 = vld [vmem:[#allocation2] ss:$0 sm:$0xff] }
  0x2c   :  { %vm160_vm4 = vcmp.eq.s32.totalorder %v159_v18, 0 }
  0x2d   :  { %v161_v20 = vsel %vm160_vm4, -1.0, %v258_v19 }
  0xfd   :  { %v132_v6 = vpop.f32.mrb[0].mxu0 }
  0xfe   :  { %v133_v7 = vadd.f32 %v182_v4, %v132_v6  ;;  %v193_v8 = vpop.f32.mrb[1].mxu0 }
 0x100   :  { %v138_v9 = vmax.f32 %v133_v7, 0.0 }
 0x102   :  { %v139_v11 = vsel %vm137_vm3, %v138_v9, 0.0 }
 0x103   :  { %v147_v12 = vmul.f32 %v185_v10, %v139_v11 }
 0x105   :  { %148 = vadd.xlane.f32.xlu0 %v147_v12 }
 0x192   :  { %v149_v15 = vpop.xlane.xlu0 %148 }
 0x193   :  { %v157_v16 = vadd.f32 %v186_v14, %v149_v15 }
 0x195   :  { %164 = vperm.xlu0 %200, %v157_v16  }
 0x214   :  { %v165_v21 = vpop.permute.xlu0 %164 }
 0x215   :  { %v167_v22 = vmul.f32 %v165_v21, %v161_v20 }
 0x217   :  { %v168_v23 = vsub.f32 0.0, %v167_v22 }
 0x219   :  { %v169_v24 = vmul.f32 1.442695, %v168_v23 }
 0x21b   :  { %201 = vpow2.f32 %v169_v24 }
 0x225   :  { %v202_v25 = vpop.eup %201 }
 0x226   :  { %v171_v26 = vadd.f32 1.0, %v202_v25 }
 0x228   :  { %203 = vrcp.f32 %v171_v26 }
 0x232   :  { %v204_v27 = vpop.eup %203 }
 0x233   :  { %175 = vst.msk [vmem:[%s339_s6] sm:$0xff] %vm174_vm5, %v204_v27 }
 0x234   :  { %180 = vsyncpa [#allocation4], 1 }
 0x235   :  { %181 = vsyncpa [#allocation6], 1 }

</bundles_post_ra>
